<compile_context>
chip_gen: v7x
topology: tpu7x:2x2x1
jax: 0.10.0
libtpu: 0.0.40
codegen_flags: <defaults>
</compile_context>

<pallas_src>
import collections.abc

import jax
import jax.numpy as jnp
from jax.experimental import pallas as pl
from jax.experimental.pallas import tpu as pltpu


def _round_up(v, m):
    return ((v + m - 1) // m) * m


_VMEM_CAPACITY_CACHE = [None]


def _vmem_capacity_bytes():
    """Generation-aware VMEM capacity (falls back to the smallest, v7x)."""
    if _VMEM_CAPACITY_CACHE[0] is None:
        cap = 64 * 1024 * 1024
        try:
            info_cap = int(pltpu.get_tpu_info().vmem_capacity_bytes)
            if info_cap >= 32 * 1024 * 1024:
                cap = info_cap
        except Exception:
            pass
        _VMEM_CAPACITY_CACHE[0] = cap
    return _VMEM_CAPACITY_CACHE[0]


# --------------------------------------------------------------------------
# Kernel
# --------------------------------------------------------------------------
def _classifier_head_kernel(x_ref, w_ref, b_ref, o_ref, acc_ref):
    """One (batch, hidden) tile: acc += x_tile @ W_tile on the MXU.

    x is cast to bf16 in-kernel (VPU cast rides under the MXU step); W is
    already bf16; accumulation is explicit f32 in a VMEM scratch; the bias is
    added in f32 and a single cast happens on the final store.
    """
    k = pl.program_id(1)

    @pl.when(k == 0)
    def _init():
        acc_ref[...] = jnp.zeros_like(acc_ref)

    acc_ref[...] += jnp.dot(
        x_ref[...].astype(jnp.bfloat16),
        w_ref[...],
        preferred_element_type=jnp.float32,
    )

    @pl.when(k == pl.num_programs(1) - 1)
    def _finalize():
        o_ref[...] = (acc_ref[...] + b_ref[...]).astype(o_ref.dtype)


# --------------------------------------------------------------------------
# Wrapper
# --------------------------------------------------------------------------
def prepare_head_params(w, b):
    """Cast W->bf16, b->f32 and pad num_classes up to a multiple of 128.

    Call ONCE at build time and cache the result — doing this per forward is
    an extra full HBM pass over the weights.
    """
    hidden, num_classes = w.shape
    n_pad = _round_up(num_classes, 128)
    wp = w.astype(jnp.bfloat16)
    bp = jnp.reshape(b, (1, num_classes)).astype(jnp.float32)
    if n_pad != num_classes:
        wp = jnp.pad(wp, ((0, 0), (0, n_pad - num_classes)))
        bp = jnp.pad(bp, ((0, 0), (0, n_pad - num_classes)))
    return wp, bp


def _vmem_bytes(tm, tk, n_pad, x_bytes, out_bytes):
    x_tile = tm * tk * x_bytes
    w_tile = tk * n_pad * 2          # bf16
    b_tile = n_pad * 4               # f32
    o_tile = tm * n_pad * out_bytes
    acc = tm * n_pad * 4             # f32 scratch (single-buffered)
    return 2 * (x_tile + w_tile + b_tile + o_tile) + acc


def _choose_tiles(m8, hidden, n_pad, x_bytes, out_bytes, budget, block_m, tk_force):
    if tk_force is not None:
        tk_candidates = [tk_force]
    else:
        tk_candidates = [hidden] + [
            c for c in (512, 256, 128) if hidden > c and hidden % c == 0
        ]
    tm = min(block_m, m8)
    while True:
        for tk in tk_candidates:
            if _vmem_bytes(tm, tk, n_pad, x_bytes, out_bytes) <= budget:
                return tm, tk
        if tm <= 8:
            # TODO(synk): add N-axis tiling instead of best-effort here.
            return 8, tk_candidates[-1]
        tm = max(8, _round_up(tm // 2, 8))


def classifier_head(x, w_prepared, b_prepared, *, num_classes=None,
                    block_m=None, tk=None, out_dtype=jnp.float32):
    """Pallas logits = x @ W + b.

    x: [batch, hidden] (any float dtype; cast to bf16 inside the kernel).
    w_prepared: [hidden, n_pad] bf16, b_prepared: [1, n_pad] f32 — produced by
    prepare_head_params() once at build time.  Returns [batch, num_classes].
    """
    batch, hidden = x.shape
    hidden_w, n_pad = w_prepared.shape
    assert hidden == hidden_w
    assert b_prepared.shape == (1, n_pad)

    if num_classes is None:
        num_classes = n_pad
    assert num_classes <= n_pad

    # Convenience fallback if un-prepared params are passed (costs a cast pass).
    if w_prepared.dtype != jnp.bfloat16 or n_pad % 128 != 0:
        w_prepared, b_prepared = prepare_head_params(w_prepared, b_prepared)
        n_pad = w_prepared.shape[1]

    capacity = _vmem_capacity_bytes()
    budget = (capacity * 3) // 4            # ~48 MiB on v7x, ~96 MiB on v5e/v6e
    if block_m is None:
        block_m = 512 if capacity >= (96 << 20) else 256
    block_m = max(8, _round_up(block_m, 8))

    x_bytes = jnp.dtype(x.dtype).itemsize
    out_bytes = jnp.dtype(out_dtype).itemsize

    # ---- batch: pad only up to a sublane multiple (<= 7 extra rows) ---------
    m8 = _round_up(batch, 8)
    xp = x if m8 == batch else jnp.pad(x, ((0, m8 - batch), (0, 0)))

    # ---- tile selection (K-tiled when the W working set is too big) ---------
    if tk is not None:
        assert hidden % tk == 0 and (tk % 128 == 0 or tk == hidden), \
            "tk must divide hidden and be a multiple of 128 (or == hidden)"
    tm, tk = _choose_tiles(m8, hidden, n_pad, x_bytes, out_bytes,
                           budget, block_m, tk)

    # Give v7x's two TensorCores at least two parallel batch steps.
    if pl.cdiv(m8, tm) < 2 and m8 >= 16:
        tm = min(tm, _round_up(pl.cdiv(m8, 2), 8))

    grid_m = pl.cdiv(m8, tm)     # ragged last tile handled by Pallas masking
    grid_k = hidden // tk

    est = _vmem_bytes(tm, tk, n_pad, x_bytes, out_bytes)
    cost = pl.CostEstimate(
        flops=2 * m8 * hidden * n_pad,
        transcendentals=0,
        bytes_accessed=(m8 * hidden * x_bytes + hidden * n_pad * 2
                        + n_pad * 4 + m8 * n_pad * out_bytes),
    )
    compiler_params = pltpu.CompilerParams(
        dimension_semantics=("parallel", "arbitrary"),
        vmem_limit_bytes=int(min(capacity, max(est + (4 << 20), 32 << 20))),
    )

    out = pl.pallas_call(
        _classifier_head_kernel,
        out_shape=jax.ShapeDtypeStruct((m8, n_pad), out_dtype),
        grid=(grid_m, grid_k),
        in_specs=[
            pl.BlockSpec((tm, tk), lambda i, k: (i, k)),       # x: batch x K tiled
            pl.BlockSpec((tk, n_pad), lambda i, k: (k, 0)),    # W: K tiled (pinned if grid_k==1)
            pl.BlockSpec((1, n_pad), lambda i, k: (0, 0)),     # b: pinned, VMEM-resident
        ],
        out_specs=pl.BlockSpec((tm, n_pad), lambda i, k: (i, 0)),
        scratch_shapes=[pltpu.VMEM((tm, n_pad), jnp.float32)],
        compiler_params=compiler_params,
        cost_estimate=cost,
    )(xp, w_prepared, b_prepared)

    # Strip the lane/batch padding before returning to the caller.
    return out[:batch, :num_classes]


# --------------------------------------------------------------------------
# BaseModel mirror
# --------------------------------------------------------------------------
class BaseModelPallas:
    """Mirrors antmmf BaseModel's contract: forward(sample_list) -> dict with
    'logits'; __call__ asserts the dict contract.  Loss/metric/registry hooks
    are framework plumbing and left as TODOs."""

    def __init__(self, config):
        self.config = config
        self._is_pretrained = False

    @property
    def is_pretrained(self):
        return self._is_pretrained

    @is_pretrained.setter
    def is_pretrained(self, x):
        self._is_pretrained = x

    def build(self):
        hidden = self.config["hidden"]
        num_classes = self.config["num_classes"]
        kw, kb = jax.random.split(jax.random.PRNGKey(42))
        # Deterministic parameter init (synthetic, not a checkpoint load).
        self.w = (jax.random.normal(kw, (hidden, num_classes), jnp.float32)
                  / jnp.sqrt(hidden))
        self.b = jax.random.normal(kb, (1, num_classes), jnp.float32) * 0.01
        # Cache the bf16 / lane-padded parameters ONCE (no per-forward cast+pad).
        self.w_prepared, self.b_prepared = prepare_head_params(self.w, self.b)
        self.num_classes = num_classes

    def forward(self, sample_list, *args, **kwargs):
        x = sample_list["features"]  # layout: [batch, hidden]
        logits = classifier_head(
            x, self.w_prepared, self.b_prepared,
            num_classes=self.num_classes,
            block_m=kwargs.get("block_m"),
            tk=kwargs.get("tk"),
            out_dtype=kwargs.get("out_dtype", jnp.float32),
        )
        return {"logits": logits}

    def __call__(self, sample_list, *args, **kwargs):
        model_output = self.forward(sample_list, *args, **kwargs)
        assert isinstance(model_output, collections.abc.Mapping), \
            "A dict must be returned from the forward of the model."
        # TODO(synk): Losses(config['losses']) / Metrics(config['metrics'])
        # evaluation depends on antmmf registry objects; not translatable here.
        return model_output


def _reference_logits(x, w, b):
    """Pure-JAX reference matching the kernel's bf16-operand / f32-acc path."""
    xr = x.astype(jnp.bfloat16).astype(jnp.float32)
    wr = w.astype(jnp.bfloat16).astype(jnp.float32)
    return xr @ wr + b.astype(jnp.float32)


if __name__ == "__main__":
    # --- toy forward (single tile, single K step) ----------------------------
    batch, hidden, num_classes = 2, 32, 16
    key = jax.random.PRNGKey(0)
    x = jax.random.normal(key, (batch, hidden), jnp.float32)

    model = BaseModelPallas({"hidden": hidden, "num_classes": num_classes,
                             "losses": [], "metrics": []})
    model.build()

    out = model({"features": x})
    logits = jax.block_until_ready(out["logits"])
    ref = _reference_logits(x, model.w, model.b)
    assert logits.shape == (batch, num_classes)
    assert jnp.allclose(logits, ref, atol=2e-4, rtol=2e-4), "mismatch vs reference"

    # --- multi batch-tile path (batch padding to 8, pinned W/b, grid_m=3) ----
    k2 = jax.random.PRNGKey(1)
    x2 = jax.random.normal(k2, (20, hidden), jnp.float32)
    out2 = model({"features": x2}, block_m=8)
    logits2 = jax.block_until_ready(out2["logits"])
    ref2 = _reference_logits(x2, model.w, model.b)
    assert logits2.shape == (20, num_classes)
    assert jnp.allclose(logits2, ref2, atol=2e-4, rtol=2e-4), "multi-tile mismatch"

    # --- K-tiled path (grid_k=2, f32 VMEM accumulator, 2 parallel M steps) ----
    hidden3, nc3, batch3 = 256, 128, 16
    model3 = BaseModelPallas({"hidden": hidden3, "num_classes": nc3,
                              "losses": [], "metrics": []})
    model3.build()
    k3 = jax.random.PRNGKey(2)
    x3 = jax.random.normal(k3, (batch3, hidden3), jnp.float32)
    out3 = model3({"features": x3}, tk=128)
    logits3 = jax.block_until_ready(out3["logits"])
    ref3 = _reference_logits(x3, model3.w, model3.b)
    assert logits3.shape == (batch3, nc3)
    assert jnp.allclose(logits3, ref3, atol=2e-4, rtol=2e-4), "K-tiled mismatch"

    print("KERNEL_OK")
</pallas_src>

<mosaic_0001>
module attributes {stable_mosaic.version = 11 : i64} {
  func.func @_classifier_head_kernel(%arg0: i32, %arg1: i32, %arg2: memref<8x32xf32, #tpu.memory_space<vmem>>, %arg3: memref<32x128xbf16, #tpu.memory_space<vmem>>, %arg4: memref<1x128xf32, #tpu.memory_space<vmem>>, %arg5: memref<8x128xf32, #tpu.memory_space<vmem>>, %arg6: memref<8x128xf32, #tpu.memory_space<vmem>>) attributes {dimension_semantics = [#tpu.dimension_semantics<parallel>, #tpu.dimension_semantics<arbitrary>], iteration_bounds = array<i64: 1, 1>, scalar_prefetch = 0 : i64, scratch_operands = 1 : i64, tpu.core_type = #tpu.core_type<tc>, window_params = [{transform_indices = @transform_0, window_bounds = array<i64: 8, 32>}, {transform_indices = @transform_1, window_bounds = array<i64: 32, 128>}, {pipeline_mode = #tpu.pipeline_mode<synchronous>, transform_indices = @transform_2, window_bounds = array<i64: 1, 128>}, {transform_indices = @transform_3, window_bounds = array<i64: 8, 128>}]} {
    %c0_i32 = arith.constant 0 : i32
    %0 = arith.cmpi eq, %arg1, %c0_i32 : i32
    %1 = arith.extui %0 : i1 to i32
    %c0_i32_0 = arith.constant 0 : i32
    %2 = arith.cmpi ne, %1, %c0_i32_0 : i32
    scf.if %2 {
      %cst_10 = arith.constant 0.000000e+00 : f32
      %13 = vector.broadcast %cst_10 : f32 to vector<8x128xf32>
      %c0_11 = arith.constant 0 : index
      %c0_12 = arith.constant 0 : index
      %14 = vector.load %arg6[%c0_11, %c0_12] : memref<8x128xf32, #tpu.memory_space<vmem>>, vector<8x128xf32>
      tpu.vector_store %arg6[%c0_11, %c0_12], %13 {strides = array<i32>} : memref<8x128xf32, #tpu.memory_space<vmem>>, vector<8x128xf32>,
    } else {
    }
    %c0 = arith.constant 0 : index
    %c0_1 = arith.constant 0 : index
    %3 = vector.load %arg6[%c0, %c0_1] : memref<8x128xf32, #tpu.memory_space<vmem>>, vector<8x128xf32>
    %c0_2 = arith.constant 0 : index
    %c0_3 = arith.constant 0 : index
    %4 = vector.load %arg2[%c0_2, %c0_3] : memref<8x32xf32, #tpu.memory_space<vmem>>, vector<8x32xf32>
    %5 = arith.truncf %4 : vector<8x32xf32> to vector<8x32xbf16>
    %c0_4 = arith.constant 0 : index
    %c0_5 = arith.constant 0 : index
    %6 = vector.load %arg3[%c0_4, %c0_5] : memref<32x128xbf16, #tpu.memory_space<vmem>>, vector<32x128xbf16>
    %cst = arith.constant dense<0.000000e+00> : vector<8x128xf32>
    %7 = tpu.matmul %5, %6, %cst {dimension_numbers = #tpu.dot_dimension_numbers<[1], [0], [0], [1], [0, 0, 1, 1], [], []>} : vector<8x32xbf16>, vector<32x128xbf16>, vector<8x128xf32> -> vector<8x128xf32>
    %8 = arith.addf %3, %7 : vector<8x128xf32>
    %c0_6 = arith.constant 0 : index
    %c0_7 = arith.constant 0 : index
    %9 = vector.load %arg6[%c0_6, %c0_7] : memref<8x128xf32, #tpu.memory_space<vmem>>, vector<8x128xf32>
    tpu.vector_store %arg6[%c0_6, %c0_7], %8 {strides = array<i32>} : memref<8x128xf32, #tpu.memory_space<vmem>>, vector<8x128xf32>,
    %c0_i32_8 = arith.constant 0 : i32
    %10 = arith.cmpi eq, %arg1, %c0_i32_8 : i32
    %11 = arith.extui %10 : i1 to i32
    %c0_i32_9 = arith.constant 0 : i32
    %12 = arith.cmpi ne, %11, %c0_i32_9 : i32
    scf.if %12 {
      %c0_10 = arith.constant 0 : index
      %c0_11 = arith.constant 0 : index
      %13 = vector.load %arg6[%c0_10, %c0_11] : memref<8x128xf32, #tpu.memory_space<vmem>>, vector<8x128xf32>
      %c0_12 = arith.constant 0 : index
      %c0_13 = arith.constant 0 : index
      %14 = vector.load %arg4[%c0_12, %c0_13] : memref<1x128xf32, #tpu.memory_space<vmem>>, vector<1x128xf32>
      %15 = vector.broadcast %14 : vector<1x128xf32> to vector<8x128xf32>
      %16 = arith.addf %13, %15 : vector<8x128xf32>
      %c0_14 = arith.constant 0 : index
      %c0_15 = arith.constant 0 : index
      %17 = vector.load %arg5[%c0_14, %c0_15] : memref<8x128xf32, #tpu.memory_space<vmem>>, vector<8x128xf32>
      tpu.vector_store %arg5[%c0_14, %c0_15], %16 {strides = array<i32>} : memref<8x128xf32, #tpu.memory_space<vmem>>, vector<8x128xf32>,
    } else {
    }
    return
  }
  func.func @transform_0(%arg0: i32, %arg1: i32) -> (i32, i32) {
    %c0_i32 = arith.constant 0 : i32
    return %arg0, %arg1 : i32, i32
  }
  func.func @transform_1(%arg0: i32, %arg1: i32) -> (i32, i32) {
    %c0_i32 = arith.constant 0 : i32
    %c0_i32_0 = arith.constant 0 : i32
    return %arg1, %c0_i32 : i32, i32
  }
  func.func @transform_2(%arg0: i32, %arg1: i32) -> (i32, i32) {
    %c0_i32 = arith.constant 0 : i32
    %c0_i32_0 = arith.constant 0 : i32
    %c0_i32_1 = arith.constant 0 : i32
    return %c0_i32, %c0_i32_0 : i32, i32
  }
  func.func @transform_3(%arg0: i32, %arg1: i32) -> (i32, i32) {
    %c0_i32 = arith.constant 0 : i32
    %c0_i32_0 = arith.constant 0 : i32
    return %arg0, %c0_i32 : i32, i32
  }
}

</mosaic_0001>

<bundles_post_ra>
// kernel: tpu_custom_call.1
= control target key start
LH: loop header
LB: loop body
LE: loop exit
PB: predicated region body
PF: predicated region fallthrough
CT: control target
= control target key end

     0   :  { %8 = vsyncpa [#allocation4], 0  ;;  %s310_s0 = inlined_call_operand.hbm [shape: f32[8,32], index: 0, kind: input, shape index: {}]   ;;  %s311_s1 = inlined_call_operand.hbm [shape: bf16[32,128], index: 1, kind: input, shape index: {}]   ;;  %s312_s2 = inlined_call_operand.vmem [shape: f32[1,128], index: 2, kind: input, shape index: {}]   ;;  %s313_s3 = inlined_call_operand.hbm [shape: f32[8,128], index: 3, kind: output, shape index: {}]  }
   0x1   :  { %9 = vsyncpa [#allocation7], 0 }
   0x2   :  { %10 = vsyncpa [#allocation5], 0  ;;  %s237_s12 = smov [#allocation3]   ;;  %s238_s14 = smov [#allocation6]  }
   0x3   :  { %s17_s13 = sshll.u32 %s237_s12, 4  ;;  %s26_s15 = sshll.u32 %s238_s14, 4  ;;  %s18_s13 = int_to_ptr.vmem [resolvable:$true] %s17_s13  ;;  %s264_s15 = int_to_ptr.vmem [resolvable:$true] %s26_s15 }
   0x4   :  { %s165_s18 = scalar_lea.hbm %s310_s0, 128 }
   0x5   :  { %p166_p0 = scmp.ne.s32.totalorder %s310_s0, %s165_s18  ;;  %p169_p1 = scmp.lt.u32.totalorder %s165_s18, %s310_s0 }
   0x7   :  { %p171_p2 = pnand %p169_p1, %p166_p0 }
   0x9   :  { %174 = shalt.err (!%p171_p2)
}
   0xa   :  { %s175_s23 = scalar_lea.vmem %s18_s13, 128  ;;  %p180_p4 = scmp.lt.s32.totalorder %s18_s13, %s18_s13 }
   0xb   :  { %p176_p3 = scmp.ne.s32.totalorder %s18_s13, %s175_s23  ;;  %p181_p5 = scmp.lt.s32.totalorder %s175_s23, %s175_s23 }
   0xd   :  { %p182_p6 = por %p181_p5, %p180_p4 }
   0xf   :  { %p183_p7 = pnand %p182_p6, %p176_p3 }
  0x11   :  { %186 = shalt.err (!%p183_p7)
}
  0x12   :  { %20 = dma.hbm_to_vmem [thread:$0]  %s310_s0, 128, %s18_s13, [#allocation4]  }
  0x13   :  { %s187_s28 = scalar_lea.hbm %s311_s1, 256 }
  0x14   :  { %p188_p8 = scmp.ne.s32.totalorder %s311_s1, %s187_s28  ;;  %p191_p9 = scmp.lt.u32.totalorder %s187_s28, %s311_s1 }
  0x16   :  { %p193_p10 = pnand %p191_p9, %p188_p8 }
  0x18   :  { %196 = shalt.err (!%p193_p10)
}
  0x19   :  { %s197_s6 = scalar_lea.vmem %s264_s15, 256  ;;  %p202_p12 = scmp.lt.s32.totalorder %s264_s15, %s264_s15 }
  0x1a   :  { %p198_p11 = scmp.ne.s32.totalorder %s264_s15, %s197_s6  ;;  %p203_p13 = scmp.lt.s32.totalorder %s197_s6, %s197_s6 }
  0x1c   :  { %p204_p0 = por %p203_p13, %p202_p12 }
  0x1e   :  { %p205_p1 = pnand %p204_p0, %p198_p11 }
  0x20   :  { %208 = shalt.err (!%p205_p1)
}
  0x21   :  { %s239_s0 = smov 64   ;;  %s240_s7 = smov 4  }
  0x22   :  { %32 = dma.hbm_to_vmem [thread:$0]  %s311_s1, 256, %s264_s15, [#allocation7], %s239_s0, %s239_s0, %s240_s7  }
  0x23   :  { %231 = dma.done.wait [#allocation4], 128  }
  0x24   :  { %232 = vsyncadd [#allocation4], 4294967168 }
  0x25   :  { %233 = dma.done.wait [#allocation7], 256  }
  0x26   :  { %234 = vsyncadd [#allocation7], 4294967040  ;;  %v241_v0 = vmov 0.0   ;;  %vm242_vm0 = vmmov 0   ;;  %v163_v1 = vld [vmem:[#allocation6] sm:$0xff]   ;;  %v164_v2 = vld [vmem:[#allocation6 + $0x8] sm:$0xff]  }
  0x27   :  { %148 = vmatprep.subr.bf16.mxu0 %v241_v0  ;;  %152 = vmatprep.mubr.msk.bf16.mxu0 %vm242_vm0, %v241_v0  ;;  %v48_v3 = vld [vmem:[#allocation3] sm:$0xff]  ;;  %vm66_vm1 = vcmask 261120   ;;  %s243_s1 = smov [#allocation8]  }
  0x28   :  { %149 = vmatpush3.bf16.msra.mxu0 %v163_v1  ;;  %v49_v4 = vpack.c.bf16 %v48_v3, %v48_v3  ;;  %v144_v5 = vld [vmem:[%s312_s2] ss:$0 sm:$0xff]  ;;  %s131_s12 = sshll.u32 %s243_s1, 4  ;;  %s132_s12 = int_to_ptr.vmem [resolvable:$true] %s131_s12 }
  0x29   :  { %150 = vmatprep.subr.bf16.mxu0 %v241_v0  ;;  %s209_s13 = scalar_lea.vmem %s132_s12, 128  ;;  %p214_p3 = scmp.lt.s32.totalorder %s132_s12, %s132_s12 }
  0x2a   :  { %p210_p2 = scmp.ne.s32.totalorder %s132_s12, %s209_s13  ;;  %p215_p4 = scmp.lt.s32.totalorder %s209_s13, %s209_s13 }
  0x2c   :  { %151 = vmatpush3.bf16.msra.mxu0 %v164_v2  ;;  %p216_p5 = por %p215_p4, %p214_p3 }
  0x2e   :  { %p217_p6 = pnand %p216_p5, %p210_p2 }
  0x2f   :  { %153 = vmatmul.mubr.msk.bf16.vlgmr.msra.gmra.mrb[0].mxu0 %vm66_vm1, %v49_v4 }
 0x102   :  { %v104_v6 = vpop.f32.mrb[0].mxu0 }
 0x103   :  { %v123_v7 = vadd.f32 %v144_v5, %v104_v6  ;;  %v154_v8 = vpop.f32.mrb[1].mxu0 }
 0x104   :  { %v107_v9 = vpop.f32.mrb[2].mxu0 }
 0x105   :  { %124 = vst [vmem:[#allocation8] sm:$0xff] %v123_v7  ;;  %v155_v10 = vpop.f32.mrb[3].mxu0 }
 0x106   :  { %220 = shalt.err (!%p217_p6)
}
 0x107   :  { %s221_s2 = scalar_lea.hbm %s313_s3, 128 }
 0x108   :  { %p222_p7 = scmp.ne.s32.totalorder %s313_s3, %s221_s2  ;;  %p225_p8 = scmp.lt.u32.totalorder %s221_s2, %s313_s3 }
 0x10a   :  { %p227_p9 = pnand %p225_p8, %p222_p7 }
 0x10c   :  { %230 = shalt.err (!%p227_p9)
}
 0x10d   :  { %134 = dma.vmem_to_hbm [thread:$0]  %s132_s12, 128, %s313_s3, [#allocation5]  }
 0x10e   :  { %235 = dma.done.wait [#allocation5], 128  }
 0x10f   :  { %236 = vsyncadd [#allocation5], 4294967168 }
 0x110   :  { %138 = vsyncpa [#allocation4], 1 }
 0x111   :  { %139 = vsyncpa [#allocation7], 1 }
 0x112   :  { %140 = vsyncpa [#allocation5], 1 }

</bundles_post_ra>
